<compile_context>
chip_gen: v7x
topology: tpu7x:2x2x1
jax: 0.10.0
libtpu: 0.0.40
codegen_flags: <defaults>
</compile_context>

<pallas_src>
import jax
import jax.numpy as jnp
from jax.experimental import pallas as pl
from jax.experimental.pallas import tpu as pltpu


_LANE = 128        # TPU lane width (last-dim tiling)
_HIDDEN_PAD = 128  # hidden 50 -> 128: lane-dense, matches the MXU tile


def _round_up(n, m):
    return (n + m - 1) // m * m


# ------------------------------ kernel body ---------------------------------

def _mlp_kernel(x_ref, w1_ref, b1_ref, w2_ref, b2_ref, w3_ref, b3_ref, o_ref):
    """Fused 3-layer MLP for one (tile_b, D) row tile.

    Weights are zero-padded to hidden=128 and stay VMEM-resident (constant
    index_maps).  The per-tile result is written as a lane-dense (1, tile_b)
    row so the store path uses full-width vst's instead of tile_b/8 masked
    1-lane stores.
    """
    x = x_ref[...]                                                   # (tb, D)

    h1 = jnp.dot(x, w1_ref[...], preferred_element_type=jnp.float32) + b1_ref[...]
    h1 = jnp.maximum(h1, 0.0)                                        # (tb, Hp) f32

    h2 = jnp.dot(h1.astype(w2_ref.dtype), w2_ref[...],
                 preferred_element_type=jnp.float32) + b2_ref[...]
    h2 = jnp.maximum(h2, 0.0)                                        # (tb, Hp) f32

    # Final layer (logical N=1) on the MXU, producing the lane-dense row
    # directly:  y[0, b] = sum_h w3[0, h] * h2[b, h].
    y = jnp.dot(w3_ref[...], h2.astype(w3_ref.dtype).T,
                preferred_element_type=jnp.float32) + b3_ref[...]    # (1, tb)
    o_ref[...] = y.astype(o_ref.dtype)


# ------------------------------ tiling logic ---------------------------------

def _vmem_estimate(tile_b, d, x_itemsize, weight_bytes, hp):
    d_pad = _round_up(d, _LANE)
    x_buf = 2 * tile_b * d_pad * x_itemsize            # double-buffered x tile
    o_buf = 2 * 8 * _round_up(tile_b, _LANE) * 4       # double-buffered (1, tile_b) f32 out
    act = 4 * tile_b * hp * 4                          # h1/h2/relayout headroom (f32)
    return x_buf + o_buf + 2 * weight_bytes + act


def _pick_tiling(batch, x_itemsize, requested_tile, d, weight_bytes, hp,
                 vmem_budget=20 * 2**20):
    """Choose (tile_b, padded_batch, num_tiles).

    * tiny batches: one sublane-aligned tile (16-row multiple for 2-byte x).
    * larger batches: 128-aligned tiles, >= 2 grid steps so both v7x
      TensorCores get work, capped so the VMEM estimate stays within budget
      (safe inside v7x's 64 MiB / 32 MiB scoped default).
    """
    sub = 16 if x_itemsize <= 2 else 8
    if batch <= _LANE:
        tile = _round_up(max(batch, sub), sub)
        return tile, tile, 1

    b_aligned = _round_up(batch, _LANE)
    tile = min(_round_up(requested_tile, _LANE), b_aligned)
    if tile >= b_aligned:                    # would collapse to a single grid step
        tile = max(_LANE, _round_up(b_aligned // 2, _LANE))
    while tile > _LANE and _vmem_estimate(tile, d, x_itemsize, weight_bytes, hp) > vmem_budget:
        tile = max(_LANE, _round_up(tile // 2, _LANE))
    padded = _round_up(batch, tile)
    return tile, padded, padded // tile


# ------------------------------ public wrapper -------------------------------

def simple_nn_forward(x, kernel_params, *, tile_b=2048):
    """x: (B, input_dim). kernel_params: padded params from pad_params().
    Returns (B,) float32 — matches the PyTorch module's .squeeze(-1)."""
    w1, b1, w2, b2, w3, b3 = kernel_params
    B, D = x.shape
    Hp = w1.shape[1]

    weight_bytes = sum(int(a.size) * a.dtype.itemsize for a in (w1, b1, w2, b2, w3, b3))
    tile, Bp, num_tiles = _pick_tiling(B, x.dtype.itemsize, tile_b, D, weight_bytes, Hp)

    if Bp != B:
        x = jnp.pad(x, ((0, Bp - B), (0, 0)))

    x_spec = pl.BlockSpec((tile, D), lambda i: (i, 0))
    const = lambda a: pl.BlockSpec(a.shape, lambda i: (0, 0))   # VMEM-resident weights
    out_spec = pl.BlockSpec((1, tile), lambda i: (0, i))        # lane-dense output row

    flops = 2 * Bp * (D * Hp + Hp * Hp + Hp)
    bytes_accessed = Bp * D * x.dtype.itemsize + weight_bytes + Bp * 4
    vmem_est = _vmem_estimate(tile, D, x.dtype.itemsize, weight_bytes, Hp)
    vmem_limit = int(min(40 * 2**20, max(16 * 2**20, 2 * vmem_est)))

    out = pl.pallas_call(
        _mlp_kernel,
        out_shape=jax.ShapeDtypeStruct((1, Bp), jnp.float32),
        grid=(num_tiles,),
        in_specs=[x_spec,
                  const(w1), const(b1),
                  const(w2), const(b2),
                  const(w3), const(b3)],
        out_specs=out_spec,
        compiler_params=pltpu.CompilerParams(
            dimension_semantics=("parallel",),        # megacore batch split on v7x
            vmem_limit_bytes=vmem_limit),
        cost_estimate=pl.CostEstimate(
            flops=flops, transcendentals=0, bytes_accessed=bytes_accessed),
    )(x, w1, b1, w2, b2, w3, b3)

    return out[0, :B]                                 # squeeze(-1) + drop batch padding


# ------------------------------ parameters -----------------------------------

def init_params(key, input_dim, hidden=50):
    """Logical params mimicking PyTorch's default Linear init.
    Weights stored as (in_features, out_features)."""
    ks = jax.random.split(key, 6)

    def lin(kw, kb, fan_in, fan_out):
        bound = 1.0 / jnp.sqrt(fan_in)
        w = jax.random.uniform(kw, (fan_in, fan_out), jnp.float32, -bound, bound)
        b = jax.random.uniform(kb, (1, fan_out), jnp.float32, -bound, bound)
        return w, b

    w1, b1 = lin(ks[0], ks[1], input_dim, hidden)
    w2, b2 = lin(ks[2], ks[3], hidden, hidden)
    w3, b3 = lin(ks[4], ks[5], hidden, 1)
    return (w1, b1, w2, b2, w3, b3)


def pad_params(params, hidden_pad=_HIDDEN_PAD, dtype=jnp.float32):
    """Zero-pad hidden 50 -> hidden_pad and lay params out for the kernel.
    Padded lanes stay exactly 0 through bias+ReLU, so results are unchanged.
    Weights are cast to `dtype` (bf16 recommended, esp. on v5e); biases stay f32."""
    w1, b1, w2, b2, w3, b3 = params
    h = w1.shape[1]
    ph = hidden_pad - h
    w1p = jnp.pad(w1, ((0, 0), (0, ph))).astype(dtype)          # (D, Hp)
    b1p = jnp.pad(b1, ((0, 0), (0, ph)))                        # (1, Hp) f32
    w2p = jnp.pad(w2, ((0, ph), (0, ph))).astype(dtype)         # (Hp, Hp)
    b2p = jnp.pad(b2, ((0, 0), (0, ph)))                        # (1, Hp) f32
    w3p = jnp.pad(w3.T, ((0, 0), (0, ph))).astype(dtype)        # (1, Hp) row
    b3p = b3.astype(jnp.float32)                                # (1, 1) f32
    return (w1p, b1p, w2p, b2p, w3p, b3p)


if __name__ == "__main__":
    key = jax.random.PRNGKey(0)
    k_x, k_p, k_x2 = jax.random.split(key, 3)

    input_dim, hidden = 32, 50
    params = init_params(k_p, input_dim, hidden)
    w1, b1, w2, b2, w3, b3 = params

    # ---- small-batch f32 path: exact semantics of the PyTorch module ----
    batch = 8
    x = jax.random.normal(k_x, (batch, input_dim), jnp.float32)
    kparams_f32 = pad_params(params, dtype=jnp.float32)
    y = simple_nn_forward(x, kparams_f32)
    jax.block_until_ready(y)

    ref = jnp.maximum(x @ w1 + b1, 0.0)
    ref = jnp.maximum(ref @ w2 + b2, 0.0)
    ref = (ref @ w3 + b3)[:, 0]
    assert y.shape == (batch,)
    assert jnp.allclose(y, ref, atol=1e-4, rtol=1e-4), "f32 mismatch vs reference"

    # ---- larger-batch bf16 path: lane-dense tiled output, 2 grid steps ----
    batch2 = 1000                               # pads to 1024 -> two 512-row tiles
    x2 = jax.random.normal(k_x2, (batch2, input_dim), jnp.float32)
    kparams_bf16 = pad_params(params, dtype=jnp.bfloat16)
    y2 = simple_nn_forward(x2.astype(jnp.bfloat16), kparams_bf16)
    jax.block_until_ready(y2)

    # bf16-faithful reference (same roundings as the kernel, f32 accumulation)
    bf = lambda a: a.astype(jnp.bfloat16)
    h1r = jnp.maximum(jnp.dot(bf(x2), bf(w1), preferred_element_type=jnp.float32) + b1, 0.0)
    h2r = jnp.maximum(jnp.dot(bf(h1r), bf(w2), preferred_element_type=jnp.float32) + b2, 0.0)
    ref2 = (jnp.dot(bf(h2r), bf(w3), preferred_element_type=jnp.float32) + b3)[:, 0]
    assert y2.shape == (batch2,)
    assert jnp.allclose(y2, ref2, atol=2e-3, rtol=2e-3), "bf16 mismatch vs reference"

    print("KERNEL_OK")
</pallas_src>

<mosaic_0001>
module attributes {stable_mosaic.version = 11 : i64} {
  func.func @_mlp_kernel(%arg0: i32, %arg1: memref<8x32xf32, #tpu.memory_space<vmem>>, %arg2: memref<32x128xf32, #tpu.memory_space<vmem>>, %arg3: memref<1x128xf32, #tpu.memory_space<vmem>>, %arg4: memref<128x128xf32, #tpu.memory_space<vmem>>, %arg5: memref<1x128xf32, #tpu.memory_space<vmem>>, %arg6: memref<1x128xf32, #tpu.memory_space<vmem>>, %arg7: memref<1x1xf32, #tpu.memory_space<vmem>>, %arg8: memref<1x8xf32, #tpu.memory_space<vmem>>) attributes {dimension_semantics = [#tpu.dimension_semantics<parallel>], iteration_bounds = array<i64: 1>, scalar_prefetch = 0 : i64, scratch_operands = 0 : i64, tpu.core_type = #tpu.core_type<tc>, window_params = [{transform_indices = @transform_0, window_bounds = array<i64: 8, 32>}, {pipeline_mode = #tpu.pipeline_mode<synchronous>, transform_indices = @transform_1, window_bounds = array<i64: 32, 128>}, {pipeline_mode = #tpu.pipeline_mode<synchronous>, transform_indices = @transform_2, window_bounds = array<i64: 1, 128>}, {pipeline_mode = #tpu.pipeline_mode<synchronous>, transform_indices = @transform_3, window_bounds = array<i64: 128, 128>}, {pipeline_mode = #tpu.pipeline_mode<synchronous>, transform_indices = @transform_4, window_bounds = array<i64: 1, 128>}, {pipeline_mode = #tpu.pipeline_mode<synchronous>, transform_indices = @transform_5, window_bounds = array<i64: 1, 128>}, {pipeline_mode = #tpu.pipeline_mode<synchronous>, transform_indices = @transform_6, window_bounds = array<i64: 1, 1>}, {transform_indices = @transform_7, window_bounds = array<i64: 1, 8>}]} {
    %c0 = arith.constant 0 : index
    %c0_0 = arith.constant 0 : index
    %0 = vector.load %arg1[%c0, %c0_0] : memref<8x32xf32, #tpu.memory_space<vmem>>, vector<8x32xf32>
    %c0_1 = arith.constant 0 : index
    %c0_2 = arith.constant 0 : index
    %1 = vector.load %arg2[%c0_1, %c0_2] : memref<32x128xf32, #tpu.memory_space<vmem>>, vector<32x128xf32>
    %cst = arith.constant dense<0.000000e+00> : vector<8x128xf32>
    %2 = tpu.matmul %0, %1, %cst {dimension_numbers = #tpu.dot_dimension_numbers<[1], [0], [0], [1], [0, 0, 1, 1], [], []>} : vector<8x32xf32>, vector<32x128xf32>, vector<8x128xf32> -> vector<8x128xf32>
    %c0_3 = arith.constant 0 : index
    %c0_4 = arith.constant 0 : index
    %3 = vector.load %arg3[%c0_3, %c0_4] : memref<1x128xf32, #tpu.memory_space<vmem>>, vector<1x128xf32>
    %4 = vector.broadcast %3 : vector<1x128xf32> to vector<8x128xf32>
    %5 = arith.addf %2, %4 : vector<8x128xf32>
    %cst_5 = arith.constant 0.000000e+00 : f32
    %6 = vector.broadcast %cst_5 : f32 to vector<8x128xf32>
    %7 = arith.maximumf %5, %6 : vector<8x128xf32>
    %c0_6 = arith.constant 0 : index
    %c0_7 = arith.constant 0 : index
    %8 = vector.load %arg4[%c0_6, %c0_7] : memref<128x128xf32, #tpu.memory_space<vmem>>, vector<128x128xf32>
    %cst_8 = arith.constant dense<0.000000e+00> : vector<8x128xf32>
    %9 = tpu.matmul %7, %8, %cst_8 {dimension_numbers = #tpu.dot_dimension_numbers<[1], [0], [0], [1], [0, 0, 1, 1], [], []>} : vector<8x128xf32>, vector<128x128xf32>, vector<8x128xf32> -> vector<8x128xf32>
    %c0_9 = arith.constant 0 : index
    %c0_10 = arith.constant 0 : index
    %10 = vector.load %arg5[%c0_9, %c0_10] : memref<1x128xf32, #tpu.memory_space<vmem>>, vector<1x128xf32>
    %11 = vector.broadcast %10 : vector<1x128xf32> to vector<8x128xf32>
    %12 = arith.addf %9, %11 : vector<8x128xf32>
    %cst_11 = arith.constant 0.000000e+00 : f32
    %13 = vector.broadcast %cst_11 : f32 to vector<8x128xf32>
    %14 = arith.maximumf %12, %13 : vector<8x128xf32>
    %c0_12 = arith.constant 0 : index
    %c0_13 = arith.constant 0 : index
    %15 = vector.load %arg6[%c0_12, %c0_13] : memref<1x128xf32, #tpu.memory_space<vmem>>, vector<1x128xf32>
    %16 = tpu.transpose %14, [1, 0] : vector<8x128xf32> -> vector<128x8xf32>
    %cst_14 = arith.constant dense<0.000000e+00> : vector<1x8xf32>
    %17 = tpu.matmul %15, %16, %cst_14 {dimension_numbers = #tpu.dot_dimension_numbers<[1], [0], [0], [1], [0, 0, 1, 1], [], []>} : vector<1x128xf32>, vector<128x8xf32>, vector<1x8xf32> -> vector<1x8xf32>
    %c0_15 = arith.constant 0 : index
    %c0_16 = arith.constant 0 : index
    %18 = vector.load %arg7[%c0_15, %c0_16] : memref<1x1xf32, #tpu.memory_space<vmem>>, vector<1x1xf32>
    %19 = vector.broadcast %18 : vector<1x1xf32> to vector<1x8xf32>
    %20 = arith.addf %17, %19 : vector<1x8xf32>
    %c0_17 = arith.constant 0 : index
    %c0_18 = arith.constant 0 : index
    %21 = vector.load %arg8[%c0_17, %c0_18] : memref<1x8xf32, #tpu.memory_space<vmem>>, vector<1x8xf32>
    tpu.vector_store %arg8[%c0_17, %c0_18], %20 {strides = array<i32>} : memref<1x8xf32, #tpu.memory_space<vmem>>, vector<1x8xf32>,
    return
  }
  func.func @transform_0(%arg0: i32) -> (i32, i32) {
    %c0_i32 = arith.constant 0 : i32
    %c0_i32_0 = arith.constant 0 : i32
    return %arg0, %c0_i32 : i32, i32
  }
  func.func @transform_1(%arg0: i32) -> (i32, i32) {
    %c0_i32 = arith.constant 0 : i32
    %c0_i32_0 = arith.constant 0 : i32
    %c0_i32_1 = arith.constant 0 : i32
    return %c0_i32, %c0_i32_0 : i32, i32
  }
  func.func @transform_2(%arg0: i32) -> (i32, i32) {
    %c0_i32 = arith.constant 0 : i32
    %c0_i32_0 = arith.constant 0 : i32
    %c0_i32_1 = arith.constant 0 : i32
    return %c0_i32, %c0_i32_0 : i32, i32
  }
  func.func @transform_3(%arg0: i32) -> (i32, i32) {
    %c0_i32 = arith.constant 0 : i32
    %c0_i32_0 = arith.constant 0 : i32
    %c0_i32_1 = arith.constant 0 : i32
    return %c0_i32, %c0_i32_0 : i32, i32
  }
  func.func @transform_4(%arg0: i32) -> (i32, i32) {
    %c0_i32 = arith.constant 0 : i32
    %c0_i32_0 = arith.constant 0 : i32
    %c0_i32_1 = arith.constant 0 : i32
    return %c0_i32, %c0_i32_0 : i32, i32
  }
  func.func @transform_5(%arg0: i32) -> (i32, i32) {
    %c0_i32 = arith.constant 0 : i32
    %c0_i32_0 = arith.constant 0 : i32
    %c0_i32_1 = arith.constant 0 : i32
    return %c0_i32, %c0_i32_0 : i32, i32
  }
  func.func @transform_6(%arg0: i32) -> (i32, i32) {
    %c0_i32 = arith.constant 0 : i32
    %c0_i32_0 = arith.constant 0 : i32
    %c0_i32_1 = arith.constant 0 : i32
    return %c0_i32, %c0_i32_0 : i32, i32
  }
  func.func @transform_7(%arg0: i32) -> (i32, i32) {
    %c0_i32 = arith.constant 0 : i32
    %c0_i32_0 = arith.constant 0 : i32
    return %c0_i32, %arg0 : i32, i32
  }
}

</mosaic_0001>

<bundles_post_ra>
// kernel: tpu_custom_call.1
= control target key start
LH: loop header
LB: loop body
LE: loop exit
PB: predicated region body
PF: predicated region fallthrough
CT: control target
= control target key end

     0   :  { %s680_s0 = inlined_call_operand.hbm [shape: f32[8,32], index: 0, kind: input, shape index: {}]   ;;  %s681_s1 = inlined_call_operand.hbm [shape: f32[32,128], index: 1, kind: input, shape index: {}]   ;;  %s682_s2 = inlined_call_operand.vmem [shape: f32[1,128], index: 2, kind: input, shape index: {}]   ;;  %s683_s3 = inlined_call_operand.hbm [shape: f32[128,128], index: 3, kind: input, shape index: {}]   ;;  %s684_s4 = inlined_call_operand.vmem [shape: f32[1,128], index: 4, kind: input, shape index: {}]   ;;  %s685_s5 = inlined_call_operand.vmem [shape: f32[1,128], index: 5, kind: input, shape index: {}]   ;;  %s686_s6 = inlined_call_operand.<no memory space> [shape: f32[1,1], index: 6, kind: input, shape index: {}]   ;;  %s687_s7 = inlined_call_operand.hbm [shape: f32[1,8], index: 7, kind: output, shape index: {}]  }
   0x1   :  { %v12_v0 = vstv %s686_s6 }
   0x2   :  { %13 = vst [vmem:[#allocation2] sm:$0x1] %v12_v0 }
   0x3   :  { %14 = vsyncpa [#allocation4], 0 }
   0x4   :  { %15 = vsyncpa [#allocation7], 0 }
   0x5   :  { %16 = vsyncpa [#allocation5], 0  ;;  %s561_s26 = smov [#allocation6]   ;;  %s467_s30 = scalar_lea.hbm %s681_s1, 512 }
   0x6   :  { %s32_s27 = sshll.u32 %s561_s26, 4  ;;  %p468_p0 = scmp.ne.s32.totalorder %s681_s1, %s467_s30  ;;  %s33_s27 = int_to_ptr.vmem [resolvable:$true] %s32_s27 }
   0x7   :  { %p471_p1 = scmp.lt.u32.totalorder %s467_s30, %s681_s1 }
   0x9   :  { %p473_p2 = pnand %p471_p1, %p468_p0 }
   0xb   :  { %476 = shalt.err (!%p473_p2)
}
   0xc   :  { %s477_s6 = scalar_lea.vmem %s33_s27, 512  ;;  %p482_p4 = scmp.lt.s32.totalorder %s33_s27, %s33_s27 }
   0xd   :  { %p478_p3 = scmp.ne.s32.totalorder %s33_s27, %s477_s6  ;;  %p483_p5 = scmp.lt.s32.totalorder %s477_s6, %s477_s6 }
   0xf   :  { %p484_p6 = por %p483_p5, %p482_p4 }
  0x11   :  { %p485_p7 = pnand %p484_p6, %p478_p3 }
  0x13   :  { %488 = shalt.err (!%p485_p7)
}
  0x14   :  { %s562_s12 = smov 128   ;;  %s563_s13 = smov 8  }
  0x15   :  { %38 = dma.hbm_to_vmem [thread:$0]  %s681_s1, 512, %s33_s27, [#allocation7], %s562_s12, %s562_s12, %s563_s13  }
  0x16   :  { %s564_s16 = smov [#allocation3]   ;;  %s565_s18 = smov [#allocation8]  }
  0x17   :  { %s23_s17 = sshll.u32 %s564_s16, 4  ;;  %s46_s19 = sshll.u32 %s565_s18, 4  ;;  %s24_s17 = int_to_ptr.vmem [resolvable:$true] %s23_s17  ;;  %s47_s19 = int_to_ptr.vmem [resolvable:$true] %s46_s19 }
  0x18   :  { %s489_s22 = scalar_lea.hbm %s680_s0, 128 }
  0x19   :  { %p490_p8 = scmp.ne.s32.totalorder %s680_s0, %s489_s22  ;;  %p493_p9 = scmp.lt.u32.totalorder %s489_s22, %s680_s0 }
  0x1b   :  { %p495_p10 = pnand %p493_p9, %p490_p8 }
  0x1d   :  { %498 = shalt.err (!%p495_p10)
}
  0x1e   :  { %s499_s1 = scalar_lea.vmem %s24_s17, 128  ;;  %p504_p12 = scmp.lt.s32.totalorder %s24_s17, %s24_s17 }
  0x1f   :  { %p500_p11 = scmp.ne.s32.totalorder %s24_s17, %s499_s1  ;;  %p505_p13 = scmp.lt.s32.totalorder %s499_s1, %s499_s1 }
  0x21   :  { %p506_p0 = por %p505_p13, %p504_p12 }
  0x23   :  { %p507_p1 = pnand %p506_p0, %p500_p11 }
  0x25   :  { %510 = shalt.err (!%p507_p1)
}
  0x26   :  { %26 = dma.hbm_to_vmem [thread:$0]  %s680_s0, 128, %s24_s17, [#allocation4]  }
  0x27   :  { %s511_s8 = scalar_lea.hbm %s683_s3, 2048 }
  0x28   :  { %p512_p2 = scmp.ne.s32.totalorder %s683_s3, %s511_s8  ;;  %p515_p3 = scmp.lt.u32.totalorder %s511_s8, %s683_s3 }
  0x2a   :  { %p517_p4 = pnand %p515_p3, %p512_p2 }
  0x2c   :  { %520 = shalt.err (!%p517_p4)
}
  0x2d   :  { %s521_s14 = scalar_lea.vmem %s47_s19, 2048  ;;  %p526_p6 = scmp.lt.s32.totalorder %s47_s19, %s47_s19 }
  0x2e   :  { %p522_p5 = scmp.ne.s32.totalorder %s47_s19, %s521_s14  ;;  %p527_p7 = scmp.lt.s32.totalorder %s521_s14, %s521_s14 }
  0x30   :  { %p528_p8 = por %p527_p7, %p526_p6 }
  0x32   :  { %p529_p9 = pnand %p528_p8, %p522_p5 }
  0x34   :  { %532 = shalt.err (!%p529_p9)
}
  0x35   :  { %52 = dma.hbm_to_vmem [thread:$0]  %s683_s3, 2048, %s47_s19, [#allocation7], %s562_s12, %s562_s12, %s563_s13  }
  0x36   :  { %555 = dma.done.wait [#allocation4], 128  }
  0x37   :  { %556 = vsyncadd [#allocation4], 4294967168 }
  0x38   :  { %557 = dma.done.wait [#allocation7], 2560  }
  0x39   :  { %558 = vsyncadd [#allocation7], 4294964736  ;;  %v566_v1 = vmov 0.0|0.0   ;;  %vm567_vm0 = vmmov 0   ;;  %v568_v2 = vmov 0.0   ;;  %v69_v3 = vld [vmem:[#allocation6] sm:$0xff]  ;;  %v256_v47 = vlaneseq }
  0x3a   :  { %426 = vmatprep.subr.bf16.mxu0 %v566_v1  ;;  %383 = vmatprep.mubr.msk.f32.mxu0 %vm567_vm0, %v568_v2  ;;  %v70_v4 = vld [vmem:[#allocation6 + $0x8] sm:$0xff]  ;;  %v71_v5 = vld [vmem:[#allocation6 + $0x10] sm:$0xff]  ;;  %v72_v7 = vld [vmem:[#allocation6 + $0x18] sm:$0xff]  ;;  %vm80_vm1 = vcmask 261120   ;;  %v569_v40 = vmov 0   ;;  %s570_s18 = smov [#allocation9]  }
  0x3b   :  { %432 = vmatprep.subr.bf16.mxu1 %v566_v1  ;;  %418 = vmatprep.mubr.msk.f32.mxu1 %vm567_vm0, %v568_v2  ;;  %v427_v6 = vpack.c.bf16 %v70_v4, %v69_v3  ;;  %v155_v8 = vld [vmem:[#allocation8] sm:$0xff]  ;;  %v156_v9 = vld [vmem:[#allocation8 + $0x8] sm:$0xff]  ;;  %v157_v10 = vld [vmem:[#allocation8 + $0x10] sm:$0xff]  ;;  %v430_v12 = vpack.c.bf16 %v72_v7, %v71_v5  ;;  %v257_v48 = vshrl.u32 %v256_v47, 7  ;;  %s338_s19 = sshll.u32 %s570_s18, 4  ;;  %vm330_vm2 = vcmask 57344   ;;  %s339_s19 = int_to_ptr.vmem [resolvable:$true] %s338_s19 }
  0x3c   :  { %v158_v11 = vld [vmem:[#allocation8 + $0x18] sm:$0xff]  ;;  %v433_v13 = vpack.c.bf16 %v156_v9, %v155_v8  ;;  %v159_v15 = vld [vmem:[#allocation8 + $0x20] sm:$0xff]  ;;  %v160_v16 = vld [vmem:[#allocation8 + $0x28] sm:$0xff]  ;;  %466 = vset.pattern.permute.xlu0 %v569_v40  ;;  %s537_s20 = scalar_lea.vmem %s339_s19, 32  ;;  %p538_p11 = scmp.lt.s32.totalorder %s339_s19, %s339_s19 }
  0x3d   :  { %428 = vmatpush3.bf16.msra.mxu0 %v427_v6  ;;  %v436_v14 = vpack.c.bf16 %v158_v11, %v157_v10  ;;  %v68_v17 = vld [vmem:[#allocation3] sm:$0xff]  ;;  %v439_v18 = vpack.c.bf16 %v160_v16, %v159_v15  ;;  %v161_v19 = vld [vmem:[#allocation8 + $0x30] sm:$0xff]  ;;  %v163_v22 = vld [vmem:[#allocation8 + $0x40] sm:$0xff]  ;;  %v258_v49 = vsub.s32 0, %v257_v48 }
  0x3e   :  { %429 = vmatprep.subr.bf16.mxu0 %v566_v1  ;;  %434 = vmatpush3.bf16.msra.mxu1 %v433_v13  ;;  %v162_v20 = vld [vmem:[#allocation8 + $0x38] sm:$0xff]  ;;  %v164_v23 = vld [vmem:[#allocation8 + $0x48] sm:$0xff]  ;;  %v165_v25 = vld [vmem:[#allocation8 + $0x50] sm:$0xff] }
  0x3f   :  { %435 = vmatprep.subr.bf16.mxu1 %v566_v1  ;;  %v442_v21 = vpack.c.bf16 %v162_v20, %v161_v19  ;;  %v445_v24 = vpack.c.bf16 %v164_v23, %v163_v22  ;;  %v166_v26 = vld [vmem:[#allocation8 + $0x58] sm:$0xff]  ;;  %v167_v28 = vld [vmem:[#allocation8 + $0x60] sm:$0xff]  ;;  %v168_v29 = vld [vmem:[#allocation8 + $0x68] sm:$0xff] }
  0x40   :  { %v448_v27 = vpack.c.bf16 %v166_v26, %v165_v25  ;;  %v451_v30 = vpack.c.bf16 %v168_v29, %v167_v28  ;;  %v169_v31 = vld [vmem:[#allocation8 + $0x70] sm:$0xff]  ;;  %v170_v32 = vld [vmem:[#allocation8 + $0x78] sm:$0xff] }
  0x41   :  { %431 = vmatpush3.bf16.msra.mxu0 %v430_v12  ;;  %v454_v33 = vpack.c.bf16 %v170_v32, %v169_v31  ;;  %v348_v34 = vld [vmem:[%s682_s2] ss:$0 sm:$0xff] }
  0x42   :  { %421 = vmatprep.subr.mxu0 %v568_v2  ;;  %437 = vmatpush3.bf16.msra.mxu1 %v436_v14  ;;  %v250_v39 = vld [vmem:[#allocation2] sm:$0x1] }
  0x43   :  { %438 = vmatprep.subr.bf16.mxu1 %v566_v1  ;;  %253 = vperm.xlu0 %466, %v250_v39   ;;  %v350_v41 = vld [vmem:[%s684_s4] ss:$0 sm:$0xff]  ;;  %s533_s4 = scalar_lea.vmem %s339_s19, 16 }
  0x44   :  { %384 = vmatmul.mubr.msk.f32.vlgmr.msra.gmra.mrb[0].mxu0 %vm80_vm1, %v68_v17  ;;  %v249_v46 = vld [vmem:[%s685_s5] sm:$0x1]  ;;  %p534_p10 = scmp.ne.s32.totalorder %s339_s19, %s533_s4  ;;  %p539_p12 = scmp.lt.s32.totalorder %s537_s20, %s533_s4 }
  0x45   :  { %423 = vmatprep.mubr.msk.f32.mxu0 %vm567_vm0, %v568_v2 }
  0x46   :  { %440 = vmatpush3.bf16.msra.mxu1 %v439_v18  ;;  %p540_p13 = por %p539_p12, %p538_p11 }
  0x47   :  { %441 = vmatprep.subr.bf16.mxu1 %v566_v1 }
  0x48   :  { %p541_p0 = pnand %p540_p13, %p534_p10 }
  0x4a   :  { %443 = vmatpush3.bf16.msra.mxu1 %v442_v21 }
  0x4b   :  { %444 = vmatprep.subr.bf16.mxu1 %v566_v1 }
  0x4e   :  { %446 = vmatpush3.bf16.msra.mxu1 %v445_v24 }
  0x4f   :  { %447 = vmatprep.subr.bf16.mxu1 %v566_v1 }
  0x52   :  { %449 = vmatpush3.bf16.msra.mxu1 %v448_v27 }
  0x53   :  { %450 = vmatprep.subr.bf16.mxu1 %v566_v1 }
  0x56   :  { %452 = vmatpush3.bf16.msra.mxu1 %v451_v30 }
  0x57   :  { %453 = vmatprep.subr.bf16.mxu1 %v566_v1 }
  0x5a   :  { %455 = vmatpush3.bf16.msra.mxu1 %v454_v33 }
  0xc2   :  { %v254_v50 = vpop.permute.xlu0 %253 }
  0xc3   :  { %v259_v51 = vrot.slane %v254_v50, %v258_v49 }
 0x117   :  { %v150_v35 = vpop.f32.mrb[0].mxu0 }
 0x118   :  { %v151_v36 = vadd.f32 %v348_v34, %v150_v35  ;;  %v385_v37 = vpop.f32.mrb[1].mxu0 }
 0x11a   :  { %v154_v38 = vmax.f32 %v151_v36, 0.0 }
 0x11c   :  { %419 = vmatmul.mubr.f32.vlgmr.msra.gmra.mrb[0].mxu1 %v154_v38 }
 0x1ef   :  { %v244_v42 = vpop.f32.mrb[0].mxu1 }
 0x1f0   :  { %v245_v43 = vadd.f32 %v350_v41, %v244_v42  ;;  %v420_v44 = vpop.f32.mrb[1].mxu1 }
 0x1f2   :  { %v248_v45 = vmax.f32 %v245_v43, 0.0 }
 0x1f4   :  { %422 = vmatpush3.xpose.msra.mxu0 %v248_v45 }
 0x1f7   :  { %424 = vmatmul.mubr.f32.vlgmr.msra.gmra.mrb[2].mxu0 %v249_v46 }
 0x2ca   :  { %v326_v52 = vpop.f32.mrb[2].mxu0 }
 0x2cb   :  { %v327_v53 = vadd.f32 %v326_v52, %v259_v51  ;;  %v425_v54 = vpop.f32.mrb[3].mxu0 }
 0x2cd   :  { %331 = vst.msk [vmem:[#allocation9] sm:$0x1] %vm330_vm2, %v327_v53 }
 0x2ce   :  { %544 = shalt.err (!%p541_p0)
}
 0x2cf   :  { %s545_s22 = scalar_lea.hbm %s687_s7, 16 }
 0x2d0   :  { %p546_p1 = scmp.ne.s32.totalorder %s687_s7, %s545_s22  ;;  %p549_p2 = scmp.lt.u32.totalorder %s545_s22, %s687_s7 }
 0x2d2   :  { %p551_p3 = pnand %p549_p2, %p546_p1 }
 0x2d4   :  { %554 = shalt.err (!%p551_p3)
}
 0x2d5   :  { %341 = dma.vmem_to_hbm [thread:$0]  %s339_s19, 16, %s687_s7, [#allocation5]  }
 0x2d6   :  { %559 = dma.done.wait [#allocation5], 16  }
 0x2d7   :  { %560 = vsyncadd [#allocation5], 4294967280 }
 0x2d8   :  { %345 = vsyncpa [#allocation4], 1 }
 0x2d9   :  { %346 = vsyncpa [#allocation7], 1 }
 0x2da   :  { %347 = vsyncpa [#allocation5], 1 }

</bundles_post_ra>
